<compile_context>
chip_gen: v6e
topology: v6e:2x2x1
jax: 0.10.0
libtpu: 0.0.40
codegen_flags: <defaults>
</compile_context>

<pallas_src>
import jax
import jax.numpy as jnp
from jax.experimental import pallas as pl
from jax.experimental.pallas import tpu as pltpu


def _symmetric_linear_kernel(x_ref, w_ref, d_ref, b_ref, o_ref):
    # x_ref : (nblk, Bp, t)  resident input
    # w_ref : (t, t)         streamed tile W[a-block, b-block]
    # d_ref : (nblk, 1, t)   diag(W), resident
    # b_ref : (nblk, 1, t)   bias, resident
    # o_ref : (nblk, Bp, t)  resident accumulator / output
    a = pl.program_id(0)
    b = pl.program_id(1)
    first = jnp.logical_and(a == 0, b == 0)
    last = jnp.logical_and(a == pl.num_programs(0) - 1,
                           b == pl.num_programs(1) - 1)

    @pl.when(first)
    def _init():
        o_ref[...] = jnp.zeros_like(o_ref)

    w = w_ref[...]                    # (t, t)
    xa = x_ref[a]                     # (Bp, t)
    xb = x_ref[b]                     # (Bp, t)

    # x[:, a-block] @ W[a,b]          -> output columns b   (x @ W term)
    nn = jnp.dot(xa, w, preferred_element_type=jnp.float32)
    # x[:, b-block] @ W[a,b].T        -> output columns a   (x @ W.T term)
    # Contract dim 1 of both operands: the MXU consumes the transposed
    # orientation directly (no VMEM/XLU transpose of the tile).
    nt = jax.lax.dot_general(
        xb, w, dimension_numbers=(((1,), (1,)), ((), ())),
        preferred_element_type=jnp.float32)

    o_ref[b] += nn
    o_ref[a] += nt

    @pl.when(last)
    def _finalize():
        o_ref[...] = (0.5 * o_ref[...] + b_ref[...]
                      - x_ref[...] * d_ref[...]).astype(o_ref.dtype)


def _round_up(v, m):
    return ((v + m - 1) // m) * m


def _pick_tile(np_, cap):
    # Largest multiple of 128 that divides np_ (np_ is itself a multiple of
    # 128, so 128 always qualifies), capped to keep the W DMA tile modest.
    cap = min(cap, np_)
    best = 128
    for t in range(128, cap + 1, 128):
        if np_ % t == 0:
            best = t
    return best


def symmetric_linear(x, weight, bias, *, max_tile=1024):
    """x: (B, N), weight: (N, N), bias: (N,) -> (B, N), float32."""
    B, N = x.shape
    assert weight.shape == (N, N) and bias.shape == (N,)

    x = x.astype(jnp.float32)
    weight = weight.astype(jnp.float32)
    bias = bias.astype(jnp.float32)

    # Pad batch to the 8-sublane granularity, N to a 128-lane multiple.
    # Zero padding is exact: padded rows/cols contribute nothing real.
    Bp = _round_up(B, 8)
    Np = _round_up(N, 128)
    tile = _pick_tile(Np, max_tile)
    nblk = Np // tile

    x_p = jnp.pad(x, ((0, Bp - B), (0, Np - N))) if (Bp, Np) != (B, N) else x
    w_p = jnp.pad(weight, ((0, Np - N), (0, Np - N))) if Np != N else weight
    b_p = jnp.pad(bias, (0, Np - N)) if Np != N else bias

    # Block-major layouts so the kernel only needs dynamic leading indices.
    x3 = x_p.reshape(Bp, nblk, tile).transpose(1, 0, 2)       # (nblk, Bp, t)
    bias3 = b_p.reshape(nblk, 1, tile)                        # (nblk, 1, t)
    diag3 = jnp.diagonal(w_p).reshape(nblk, 1, tile)          # (nblk, 1, t)

    out3 = pl.pallas_call(
        _symmetric_linear_kernel,
        out_shape=jax.ShapeDtypeStruct((nblk, Bp, tile), jnp.float32),
        grid_spec=pltpu.PrefetchScalarGridSpec(
            num_scalar_prefetch=0,
            grid=(nblk, nblk),              # (a: W row-blocks, b: W col-blocks)
            in_specs=[
                pl.BlockSpec((nblk, Bp, tile), lambda a, b: (0, 0, 0)),  # x (resident)
                pl.BlockSpec((tile, tile), lambda a, b: (a, b)),         # W tile (read once)
                pl.BlockSpec((nblk, 1, tile), lambda a, b: (0, 0, 0)),   # diag(W) (resident)
                pl.BlockSpec((nblk, 1, tile), lambda a, b: (0, 0, 0)),   # bias (resident)
            ],
            out_specs=pl.BlockSpec((nblk, Bp, tile), lambda a, b: (0, 0, 0)),
        ),
        compiler_params=pltpu.CompilerParams(
            dimension_semantics=("arbitrary", "arbitrary"),
            vmem_limit_bytes=32 * 1024 * 1024,
        ),
    )(x3, w_p, diag3, bias3)

    out = out3.transpose(1, 0, 2).reshape(Bp, Np)
    if (Bp, Np) != (B, N):
        out = out[:B, :N]
    return out


def init_symmetric_linear_params(key, n_neuron):
    """Mirror Symmetric_Linear.__init__ (symmetric, zero-diagonal init)."""
    kw, kb = jax.random.split(key)
    W = jax.random.normal(kw, (n_neuron, n_neuron), jnp.float32) * 0.01
    W = W + W.T
    W = W - jnp.diag(jnp.diag(W))
    bias = jax.random.normal(kb, (n_neuron,), jnp.float32) * 0.01
    return W, bias


def _reference(x, W, bias):
    W_eff = (W + W.T) / 2 - jnp.diag(jnp.diag(W))
    return jnp.dot(x, W_eff.T, precision=jax.lax.Precision.HIGHEST) + bias


if __name__ == "__main__":
    key = jax.random.PRNGKey(0)

    # Config 1: generic (non-symmetric, nonzero-diagonal) W -- the forward must
    # re-symmetrize it exactly like the PyTorch module.  max_tile=128 forces a
    # 3x3 block grid, exercising the single-pass two-sided accumulation and
    # batch padding to the 8-sublane granularity.
    n_neuron, batch = 384, 5
    kx, kw, kb = jax.random.split(key, 3)
    x = jax.random.normal(kx, (batch, n_neuron), jnp.float32)
    W = jax.random.normal(kw, (n_neuron, n_neuron), jnp.float32) * 0.05
    bias = jax.random.normal(kb, (n_neuron,), jnp.float32) * 0.01

    y = symmetric_linear(x, W, bias, max_tile=128)
    jax.block_until_ready(y)
    y_ref = _reference(x, W, bias)
    assert y.shape == (batch, n_neuron)
    assert jnp.allclose(y, y_ref, atol=1e-4, rtol=1e-4), float(
        jnp.max(jnp.abs(y - y_ref)))

    # Config 2: torch-style symmetric zero-diagonal init, no padding, a single
    # (1,1) grid step (init + accumulate + finalize in one invocation).
    W2, b2 = init_symmetric_linear_params(jax.random.PRNGKey(1), 128)
    x2 = jax.random.normal(jax.random.PRNGKey(2), (8, 128), jnp.float32)
    y2 = symmetric_linear(x2, W2, b2)
    jax.block_until_ready(y2)
    assert jnp.allclose(y2, _reference(x2, W2, b2), atol=1e-4, rtol=1e-4)

    print("KERNEL_OK")
</pallas_src>

<mosaic_0001>
module attributes {stable_mosaic.version = 11 : i64} {
  func.func @_symmetric_linear_kernel(%arg0: i32, %arg1: i32, %arg2: memref<3x8x128xf32, #tpu.memory_space<vmem>>, %arg3: memref<128x128xf32, #tpu.memory_space<vmem>>, %arg4: memref<3x1x128xf32, #tpu.memory_space<vmem>>, %arg5: memref<3x1x128xf32, #tpu.memory_space<vmem>>, %arg6: memref<3x8x128xf32, #tpu.memory_space<vmem>>) attributes {dimension_semantics = [#tpu.dimension_semantics<arbitrary>, #tpu.dimension_semantics<arbitrary>], iteration_bounds = array<i64: 3, 3>, scalar_prefetch = 0 : i64, scratch_operands = 0 : i64, tpu.core_type = #tpu.core_type<tc>, window_params = [{pipeline_mode = #tpu.pipeline_mode<synchronous>, transform_indices = @transform_0, window_bounds = array<i64: 3, 8, 128>}, {transform_indices = @transform_1, window_bounds = array<i64: 128, 128>}, {pipeline_mode = #tpu.pipeline_mode<synchronous>, transform_indices = @transform_2, window_bounds = array<i64: 3, 1, 128>}, {pipeline_mode = #tpu.pipeline_mode<synchronous>, transform_indices = @transform_3, window_bounds = array<i64: 3, 1, 128>}, {pipeline_mode = #tpu.pipeline_mode<synchronous>, transform_indices = @transform_4, window_bounds = array<i64: 3, 8, 128>}]} {
    %c0_i32 = arith.constant 0 : i32
    %0 = arith.cmpi eq, %arg0, %c0_i32 : i32
    %c0_i32_0 = arith.constant 0 : i32
    %1 = arith.cmpi eq, %arg1, %c0_i32_0 : i32
    %2 = arith.andi %0, %1 : i1
    %c2_i32 = arith.constant 2 : i32
    %3 = arith.cmpi eq, %arg0, %c2_i32 : i32
    %c2_i32_1 = arith.constant 2 : i32
    %4 = arith.cmpi eq, %arg1, %c2_i32_1 : i32
    %5 = arith.andi %3, %4 : i1
    %6 = arith.extui %2 : i1 to i32
    %c0_i32_2 = arith.constant 0 : i32
    %7 = arith.cmpi ne, %6, %c0_i32_2 : i32
    scf.if %7 {
      %cst_18 = arith.constant 0.000000e+00 : f32
      %35 = vector.broadcast %cst_18 : f32 to vector<3x8x128xf32>
      %c0_19 = arith.constant 0 : index
      %c0_20 = arith.constant 0 : index
      %c0_21 = arith.constant 0 : index
      %36 = vector.load %arg6[%c0_19, %c0_20, %c0_21] : memref<3x8x128xf32, #tpu.memory_space<vmem>>, vector<3x8x128xf32>
      tpu.vector_store %arg6[%c0_19, %c0_20, %c0_21], %35 {strides = array<i32>} : memref<3x8x128xf32, #tpu.memory_space<vmem>>, vector<3x8x128xf32>,
    } else {
    }
    %c0 = arith.constant 0 : index
    %c0_3 = arith.constant 0 : index
    %8 = vector.load %arg3[%c0, %c0_3] : memref<128x128xf32, #tpu.memory_space<vmem>>, vector<128x128xf32>
    %9 = arith.index_cast %arg0 : i32 to index
    %c0_4 = arith.constant 0 : index
    %c0_5 = arith.constant 0 : index
    %10 = vector.load %arg2[%9, %c0_4, %c0_5] : memref<3x8x128xf32, #tpu.memory_space<vmem>>, vector<1x8x128xf32>
    %11 = vector.shape_cast %10 : vector<1x8x128xf32> to vector<8x128xf32>
    %12 = arith.index_cast %arg1 : i32 to index
    %c0_6 = arith.constant 0 : index
    %c0_7 = arith.constant 0 : index
    %13 = vector.load %arg2[%12, %c0_6, %c0_7] : memref<3x8x128xf32, #tpu.memory_space<vmem>>, vector<1x8x128xf32>
    %14 = vector.shape_cast %13 : vector<1x8x128xf32> to vector<8x128xf32>
    %cst = arith.constant dense<0.000000e+00> : vector<8x128xf32>
    %15 = tpu.matmul %11, %8, %cst {dimension_numbers = #tpu.dot_dimension_numbers<[1], [0], [0], [1], [0, 0, 1, 1], [], []>} : vector<8x128xf32>, vector<128x128xf32>, vector<8x128xf32> -> vector<8x128xf32>
    %cst_8 = arith.constant dense<0.000000e+00> : vector<8x128xf32>
    %16 = tpu.matmul %14, %8, %cst_8 {dimension_numbers = #tpu.dot_dimension_numbers<[1], [1], [0], [0], [0, 0, 1, 0], [], []>} : vector<8x128xf32>, vector<128x128xf32>, vector<8x128xf32> -> vector<8x128xf32>
    %17 = arith.index_cast %arg1 : i32 to index
    %c0_9 = arith.constant 0 : index
    %c0_10 = arith.constant 0 : index
    %18 = vector.load %arg6[%17, %c0_9, %c0_10] : memref<3x8x128xf32, #tpu.memory_space<vmem>>, vector<1x8x128xf32>
    %19 = vector.shape_cast %18 : vector<1x8x128xf32> to vector<8x128xf32>
    %20 = arith.addf %19, %15 : vector<8x128xf32>
    %21 = arith.index_cast %arg1 : i32 to index
    %c0_11 = arith.constant 0 : index
    %c0_12 = arith.constant 0 : index
    %22 = vector.load %arg6[%21, %c0_11, %c0_12] : memref<3x8x128xf32, #tpu.memory_space<vmem>>, vector<1x8x128xf32>
    %23 = vector.shape_cast %22 : vector<1x8x128xf32> to vector<8x128xf32>
    %24 = vector.shape_cast %20 : vector<8x128xf32> to vector<1x8x128xf32>
    tpu.vector_store %arg6[%21, %c0_11, %c0_12], %24 {strides = array<i32>} : memref<3x8x128xf32, #tpu.memory_space<vmem>>, vector<1x8x128xf32>,
    %25 = arith.index_cast %arg0 : i32 to index
    %c0_13 = arith.constant 0 : index
    %c0_14 = arith.constant 0 : index
    %26 = vector.load %arg6[%25, %c0_13, %c0_14] : memref<3x8x128xf32, #tpu.memory_space<vmem>>, vector<1x8x128xf32>
    %27 = vector.shape_cast %26 : vector<1x8x128xf32> to vector<8x128xf32>
    %28 = arith.addf %27, %16 : vector<8x128xf32>
    %29 = arith.index_cast %arg0 : i32 to index
    %c0_15 = arith.constant 0 : index
    %c0_16 = arith.constant 0 : index
    %30 = vector.load %arg6[%29, %c0_15, %c0_16] : memref<3x8x128xf32, #tpu.memory_space<vmem>>, vector<1x8x128xf32>
    %31 = vector.shape_cast %30 : vector<1x8x128xf32> to vector<8x128xf32>
    %32 = vector.shape_cast %28 : vector<8x128xf32> to vector<1x8x128xf32>
    tpu.vector_store %arg6[%29, %c0_15, %c0_16], %32 {strides = array<i32>} : memref<3x8x128xf32, #tpu.memory_space<vmem>>, vector<1x8x128xf32>,
    %33 = arith.extui %5 : i1 to i32
    %c0_i32_17 = arith.constant 0 : i32
    %34 = arith.cmpi ne, %33, %c0_i32_17 : i32
    scf.if %34 {
      %c0_18 = arith.constant 0 : index
      %c0_19 = arith.constant 0 : index
      %c0_20 = arith.constant 0 : index
      %35 = vector.load %arg6[%c0_18, %c0_19, %c0_20] : memref<3x8x128xf32, #tpu.memory_space<vmem>>, vector<3x8x128xf32>
      %cst_21 = arith.constant 5.000000e-01 : f32
      %36 = vector.broadcast %cst_21 : f32 to vector<3x8x128xf32>
      %37 = arith.mulf %36, %35 : vector<3x8x128xf32>
      %c0_22 = arith.constant 0 : index
      %c0_23 = arith.constant 0 : index
      %c0_24 = arith.constant 0 : index
      %38 = vector.load %arg5[%c0_22, %c0_23, %c0_24] : memref<3x1x128xf32, #tpu.memory_space<vmem>>, vector<3x1x128xf32>
      %39 = vector.broadcast %38 : vector<3x1x128xf32> to vector<3x8x128xf32>
      %40 = arith.addf %37, %39 : vector<3x8x128xf32>
      %c0_25 = arith.constant 0 : index
      %c0_26 = arith.constant 0 : index
      %c0_27 = arith.constant 0 : index
      %41 = vector.load %arg2[%c0_25, %c0_26, %c0_27] : memref<3x8x128xf32, #tpu.memory_space<vmem>>, vector<3x8x128xf32>
      %c0_28 = arith.constant 0 : index
      %c0_29 = arith.constant 0 : index
      %c0_30 = arith.constant 0 : index
      %42 = vector.load %arg4[%c0_28, %c0_29, %c0_30] : memref<3x1x128xf32, #tpu.memory_space<vmem>>, vector<3x1x128xf32>
      %43 = vector.broadcast %42 : vector<3x1x128xf32> to vector<3x8x128xf32>
      %44 = arith.mulf %41, %43 : vector<3x8x128xf32>
      %45 = arith.subf %40, %44 : vector<3x8x128xf32>
      %c0_31 = arith.constant 0 : index
      %c0_32 = arith.constant 0 : index
      %c0_33 = arith.constant 0 : index
      %46 = vector.load %arg6[%c0_31, %c0_32, %c0_33] : memref<3x8x128xf32, #tpu.memory_space<vmem>>, vector<3x8x128xf32>
      tpu.vector_store %arg6[%c0_31, %c0_32, %c0_33], %45 {strides = array<i32>} : memref<3x8x128xf32, #tpu.memory_space<vmem>>, vector<3x8x128xf32>,
    } else {
    }
    return
  }
  func.func @transform_0(%arg0: i32, %arg1: i32) -> (i32, i32, i32) {
    %c0_i32 = arith.constant 0 : i32
    %c0_i32_0 = arith.constant 0 : i32
    %c0_i32_1 = arith.constant 0 : i32
    %c0_i32_2 = arith.constant 0 : i32
    return %c0_i32, %c0_i32_0, %c0_i32_1 : i32, i32, i32
  }
  func.func @transform_1(%arg0: i32, %arg1: i32) -> (i32, i32) {
    %c0_i32 = arith.constant 0 : i32
    return %arg0, %arg1 : i32, i32
  }
  func.func @transform_2(%arg0: i32, %arg1: i32) -> (i32, i32, i32) {
    %c0_i32 = arith.constant 0 : i32
    %c0_i32_0 = arith.constant 0 : i32
    %c0_i32_1 = arith.constant 0 : i32
    %c0_i32_2 = arith.constant 0 : i32
    return %c0_i32, %c0_i32_0, %c0_i32_1 : i32, i32, i32
  }
  func.func @transform_3(%arg0: i32, %arg1: i32) -> (i32, i32, i32) {
    %c0_i32 = arith.constant 0 : i32
    %c0_i32_0 = arith.constant 0 : i32
    %c0_i32_1 = arith.constant 0 : i32
    %c0_i32_2 = arith.constant 0 : i32
    return %c0_i32, %c0_i32_0, %c0_i32_1 : i32, i32, i32
  }
  func.func @transform_4(%arg0: i32, %arg1: i32) -> (i32, i32, i32) {
    %c0_i32 = arith.constant 0 : i32
    %c0_i32_0 = arith.constant 0 : i32
    %c0_i32_1 = arith.constant 0 : i32
    %c0_i32_2 = arith.constant 0 : i32
    return %c0_i32, %c0_i32_0, %c0_i32_1 : i32, i32, i32
  }
}

</mosaic_0001>

<bundles_post_ra>
// kernel: tpu_custom_call.1
= control target key start
LH: loop header
LB: loop body
LE: loop exit
PB: predicated region body
PF: predicated region fallthrough
CT: control target
= control target key end

     0   :  { %s1313_s0 = inlined_call_operand.hbm [shape: f32[3,8,128], index: 0, kind: input, shape index: {}]   ;;  %s1314_s1 = inlined_call_operand.hbm [shape: f32[384,384], index: 1, kind: input, shape index: {}]   ;;  %s1315_s2 = inlined_call_operand.vmem [shape: f32[3,1,128], index: 2, kind: input, shape index: {}]   ;;  %s1316_s3 = inlined_call_operand.hbm [shape: f32[3,1,128], index: 3, kind: input, shape index: {}]   ;;  %s1317_s4 = inlined_call_operand.hbm [shape: f32[3,8,128], index: 4, kind: output, shape index: {}]  }
   0x1   :  { %1323 = sst [smem:[#allocation15_spill]] %s1313_s0 }
   0x2   :  { %1324 = sst [smem:[#allocation16_spill]] %s1316_s3 }
   0x3   :  { %9 = vsyncpa [#allocation3], 0 }
   0x4   :  { %10 = vsyncpa [#allocation6], 0 }
   0x5   :  { %12 = vsyncpa [#allocation6 + $0x1], 0 }
   0x6   :  { %13 = vsyncpa [#allocation4], 0  ;;  %s1062_s15 = smov 0   ;;  %s1064_s16 = smov 0  }
   0x7   :  { %s1066_s17 = smov 0   ;;  %s1068_s18 = smov 0  }
   0x8   :  { %s1070_s19 = smov 0   ;;  %s1072_s20 = smov 0  }
   0x9   :  { %s1074_s21 = smov 0   ;;  %s1076_s22 = smov 0  }
   0xa LB: > { %1325 = sst [smem:[#allocation13_spill]] %s1021_s22  ;;  %s1101_s23 = sadd.s32 4294967295, %s1021_s22   ;;  %s1021_s22 = sphi %s1076_s22, %s19_s22   ;;  %s1017_s21 = sphi %s1074_s21, %s1349_s21   ;;  %s1013_s20 = sphi %s1072_s20, %s1348_s20   ;;  %s1009_s19 = sphi %s1070_s19, %s1347_s19   ;;  %s1005_s18 = sphi %s1068_s18, %s1346_s18   ;;  %s1001_s17 = sphi %s1066_s17, %s1345_s17   ;;  %s997_s16 = sphi %s1064_s16, %s1344_s16   ;;  %s993_s15 = sphi %s1062_s15, %s1343_s15  }
   0xb   : > { %p68_p0 = scmp.ne.s32.totalorder %s1001_s17, %s997_s16  ;;  %p69_p1 = scmp.eq.s32.totalorder %s1021_s22, 0 }
   0xc   : > { %p74_p2 = scmp.ne.s32.totalorder %s997_s16, %s993_s15  ;;  %p1318_p3 = scmp.eq.s32.totalorder %s1101_s23, 0 }
   0xd   : > { %p70_p4 = por %p69_p1, %p68_p0  ;;  %p601_p5 = scmp.ge.s32.totalorder %s1021_s22, 1 }
   0xe   : > { %p1112_p6 = por %p1318_p3, %p74_p2  ;;  %p148_p7 = scmp.lt.s32.totalorder %s1021_s22, 10 }
   0xf   : > { %s1023_s27 = smov [#allocation7]   ;;  %p757_p10 = scmp.lt.s32.totalorder %s1021_s22, 9 }
  0x10   : > { %p1117_p8 = pnand %p601_p5, %p148_p7  ;;  %s176_s28 = sshll.u32 %s1023_s27, 4  ;;  %s177_s28 = int_to_ptr.vmem [resolvable:$true] %s176_s28 }
  0x11   : > { %p1130_p12 = pnand %p757_p10, %p70_p4  ;;  %s850_s5 = scalar_lea.vmem %s177_s28, 48 }
  0x12   : > { %p744_p9 = pneg %p1117_p8  ;;  %p851_p0 = scmp.ne.s32.totalorder %s177_s28, %s850_s5 }
  0x13   : > { %s857_s6 = scalar_lea.vmem %s177_s28, 64  ;;  %p858_p5 = scmp.lt.s32.totalorder %s177_s28, %s177_s28 }
  0x14   : > { %p1126_p11 = pnand %p744_p9, %p1318_p3  ;;  %p859_p7 = scmp.lt.s32.totalorder %s857_s6, %s850_s5 }
  0x16   : > { %p841_p13 = pneg %p1126_p11  ;;  %p860_p9 = por %p859_p7, %p858_p5 }
  0x18   : > { %p853_p1 = pnand %p851_p0, %p841_p13 }
  0x1a   : > { %p854_p2 = pneg %p853_p1 }
  0x1c   : > { %p861_p3 = pnand %p860_p9, %p854_p2 }
  0x1e   : > { %864 = shalt.err (!%p861_p3)
}
  0x1f   : > { %s1024_s7 = smov 16   ;;  %s1025_s8 = smov 1  }
  0x20   : > { %s1330_s3 = sld [smem:[#allocation16_spill]]  ;;  %s1026_s11 = smov [#allocation2]  }
  0x21   : > { %s160_s12 = sshll.u32 %s1026_s11, 4  ;;  %s161_s12 = int_to_ptr.vmem [resolvable:$true] %s160_s12 }
  0x22   : > { %s876_s13 = scalar_lea.vmem %s161_s12, 384  ;;  %p884_p1 = scmp.lt.s32.totalorder %s161_s12, %s161_s12 }
  0x23   : > { %p877_p4 = scmp.ne.s32.totalorder %s161_s12, %s876_s13  ;;  %p885_p3 = scmp.lt.s32.totalorder %s876_s13, %s876_s13 }
  0x25   : > { %p879_p10 = pnand %p877_p4, %p841_p13  ;;  %p886_p2 = por %p885_p3, %p884_p1 }
  0x26   : > { %750 = dma.hbm_to_vmem [thread:$0]  (!%p1126_p11), %s1330_s3, 48, %s177_s28, [#allocation6], %s1024_s7, %s1024_s7, %s1025_s8  }
  0x27   : > { %p880_p0 = pneg %p879_p10 }
  0x29   : > { %p887_p5 = pnand %p886_p2, %p880_p0 }
  0x2b   : > { %890 = shalt.err (!%p887_p5)
}
  0x2c   : > { %s1319_s14 = smov 128   ;;  %s1320_s15 = smov 8  }
  0x2d   : > { %s1331_s0 = sld [smem:[#allocation15_spill]]  ;;  %s28_s5 = sadd.s32 1, %s1013_s20 }
  0x2e   : > { %p29_p13 = scmp.ge.s32.totalorder %s28_s5, 3  ;;  %s31_s6 = sadd.s32 1, %s1017_s21 }
  0x2f   : > { %s190_s7 = sand.u32 1, %s1021_s22   ;;  %s192_s8 = sand.u32 1, %s1001_s17  }
  0x30   : > { %s1351_s5 = smov (%p29_p13, %s28_s5), 0  ;;  %s1353_s6 = smov (!%p29_p13, %s31_s6), %s1017_s21 }
  0x31   : > { %1332 = sst [smem:[#allocation14_spill]] %s1351_s5  ;;  %s57_s29 = ssub.s32 %s1013_s20, %s1351_s5 }
  0x32   : > { %p33_p7 = scmp.ge.s32.totalorder %s1353_s6, 3  ;;  %s605_s9 = sshll.u32 %s192_s8, 7 }
  0x33   : > { %747 = dma.hbm_to_vmem [thread:$0]  (!%p1126_p11), %s1331_s0, 384, %s161_s12, [#allocation3], %s1319_s14, %s1319_s14, %s1320_s15  }
  0x34   : > { %s729_s10 = smul.u32 48, %s1017_s21  ;;  %s1355_s6 = smov (%p33_p7, %s1353_s6), 0 }
  0x35   : > { %s194_s12 = scalar_lea.vmem [#allocation5], %s605_s9  ;;  %s56_s27 = ssub.s32 %s1017_s21, %s1355_s6 }
  0x36   : > { %s200_s11 = sadd.s32 %s1013_s20, %s729_s10  ;;  %s203_s13 = sshll.u32 %s194_s12, 4  ;;  %s204_s13 = int_to_ptr.vmem [resolvable:$true] %s203_s13 }
  0x37   : > { %s608_s28 = sshll.u32 %s200_s11, 7  ;;  %s58_s14 = sor.u32 %s57_s29, %s56_s27 }
  0x38   : > { %s202_s0 = scalar_lea.hbm %s1314_s1, %s608_s28  ;;  %p59_p11 = scmp.eq.s32.totalorder %s58_s14, 0 }
  0x39   : > { %s1333_s3 = sadd.s32 1, %s1001_s17  ;;  %s191_s8 = scalar_lea.sflag [#allocation6], %s190_s7 }
  0x3a   : > { %s1176_s5 = scalar_select %p59_p11, %s1001_s17, %s1333_s3  }
  0x3b   : > { %p893_p9 = pneg %p1130_p12  ;;  %s904_s22 = scalar_lea.vmem %s204_s13, 2048 }
  0x3c   : > { %p905_p4 = scmp.ne.s32.totalorder %s204_s13, %s904_s22  ;;  %s1029_s9 = smov [#allocation5]  }
  0x3d   : > { %s909_s10 = sshll.u32 %s1029_s9, 4  ;;  %s910_s10 = int_to_ptr.vmem [resolvable:$false] %s909_s10 }
  0x3e   : > { %p907_p10 = pnand %p905_p4, %p893_p9  ;;  %s911_s29 = scalar_lea.vmem %s910_s10, 4096 }
  0x3f   : > { %p912_p1 = scmp.lt.s32.totalorder %s204_s13, %s910_s10  ;;  %p913_p3 = scmp.lt.s32.totalorder %s911_s29, %s904_s22 }
  0x40   : > { %p908_p0 = pneg %p907_p10 }
  0x41   : > { %p914_p2 = por %p913_p3, %p912_p1 }
  0x43   : > { %p915_p5 = pnand %p914_p2, %p908_p0 }
  0x45   : > { %918 = shalt.err (!%p915_p5)
}
  0x46   : > { %s1030_s24 = smov 384   ;;  %s1334_s3 = smov 8  }
  0x47   : > { %s1335_s14 = smov 128   ;;  %215 = sbr.rel (%p1117_p8) target bundleno = 388 (0x184), region = 36 }
  0x48   : > { %754 = dma.hbm_to_vmem [thread:$0]  (!%p1130_p12), %s202_s0, 2048, %s204_s13, %s191_s8, %s1030_s24, %s1335_s14, %s1334_s3  }
  0x49   : > { %p1336_p13 = scmp.eq.s32.totalorder (!%p1117_p8), %s1101_s23, 0 }
  0x4c   : > { %976 = dma.done.wait (%p1336_p13), [#allocation3], 384   ;;  %p1337_p7 = pmov %p1336_p13 }
  0x4d   : > { %s221_s22 = sand.u32 1, %s1101_s23   ;;  %s223_s15 = sand.u32 1, %s997_s16  }
  0x4e   : > { %978 = vsyncadd (%p1337_p7), [#allocation3], 4294966912  ;;  %s611_s7 = sshll.u32 %s223_s15, 7  ;;  %s222_s11 = scalar_lea.sflag [#allocation6], %s221_s22 }
  0x4f   : > { %s1192_s30 = scalar_lea.vmem [#allocation5], %s611_s7 }
  0x50   : > { %980 = dma.done.wait (%p1112_p6), %s222_s11, 2048  }
  0x51   : > { %982 = vsyncadd (%p1112_p6), %s222_s11, 4294965248  ;;  %p1338_p8 = pmov %p1337_p7 }
  0x52   : > { %p1339_p12 = pmov %p1337_p7 }
  0x53   : > { %984 = dma.done.wait (%p1338_p8), [#allocation6], 48  }
  0x54   : > { %986 = vsyncadd (%p1339_p12), [#allocation6], 4294967248  ;;  %p250_p11 = scmp.eq.s32.totalorder %s1009_s19, 0  ;;  %p251_p9 = scmp.eq.s32.totalorder %s1005_s18, 0 }
  0x55   : > { %p254_p4 = scmp.eq.s32.totalorder %s1009_s19, 2  ;;  %p255_p10 = scmp.eq.s32.totalorder %s1005_s18, 2 }
  0x56   : > { %p252_p0 = pnand %p251_p9, %p250_p11 }
  0x57   : > { %p1206_p1 = pnand %p255_p10, %p254_p4 }
  0x58   : > { %259 = sbr.rel (%p252_p0) target bundleno = 96 (0x60), region = 52 }
  0x5d   : > { %v1031_v0 = vmov 0.0  }
  0x5e   : > { %260 = vst [vmem:[#allocation8] sm:$0xff] %v1031_v0  ;;  %261 = vst [vmem:[#allocation8 + $0x8] sm:$0xff] %v1031_v0 }
  0x5f   : > { %262 = vst [vmem:[#allocation8 + $0x10] sm:$0xff] %v1031_v0 }
  0x60 PF: > { %v278_v1 = vld [vmem:[%s1192_s30 + $0x78] sm:$0xff]  ;;  %v1032_v2 = vmov 0.0   ;;  %v277_v3 = vld [vmem:[%s1192_s30 + $0x70] sm:$0xff]  ;;  %vm1033_vm0 = vmmov 0   ;;  %v276_v4 = vld [vmem:[%s1192_s30 + $0x68] sm:$0xff]  ;;  %s613_s25 = sshll.u32 %s1009_s19, 3 }
  0x61   : > { %694 = vmatprep.subr.mxu1 %v1032_v2  ;;  %659 = vmatprep.subr.mxu0 %v1032_v2  ;;  %v275_v5 = vld [vmem:[%s1192_s30 + $0x60] sm:$0xff]  ;;  %v274_v6 = vld [vmem:[%s1192_s30 + $0x58] sm:$0xff]  ;;  %v273_v7 = vld [vmem:[%s1192_s30 + $0x50] sm:$0xff]  ;;  %s280_s26 = scalar_lea.vmem [#allocation2], %s613_s25  ;;  %s614_s12 = sshll.u32 %s1005_s18, 3 }
  0x62   : > { %695 = vmatpush3.xpose.msra.mxu1 %v278_v1  ;;  %660 = vmatpush3.msra.mxu0 %v278_v1  ;;  %v272_v8 = vld [vmem:[%s1192_s30 + $0x48] sm:$0xff]  ;;  %v271_v9 = vld [vmem:[%s1192_s30 + $0x40] sm:$0xff]  ;;  %v270_v10 = vld [vmem:[%s1192_s30 + $0x38] sm:$0xff]  ;;  %s283_s13 = scalar_lea.vmem [#allocation2], %s614_s12  ;;  %s425_s27 = scalar_lea.vmem [#allocation8], %s614_s12 }
  0x63   : > { %696 = vmatprep.subr.mxu1 %v1032_v2  ;;  %661 = vmatprep.subr.mxu0 %v1032_v2  ;;  %v269_v11 = vld [vmem:[%s1192_s30 + $0x30] sm:$0xff]  ;;  %v268_v12 = vld [vmem:[%s1192_s30 + $0x28] sm:$0xff]  ;;  %v267_v13 = vld [vmem:[%s1192_s30 + $0x20] sm:$0xff]  ;;  %s429_s28 = scalar_lea.vmem [#allocation8], %s613_s25 }
  0x64   : > { %662 = vmatpush3.msra.mxu0 %v277_v3  ;;  %691 = vmatprep.mubr.msk.f32.mxu0 %vm1033_vm0, %v1032_v2  ;;  %v266_v14 = vld [vmem:[%s1192_s30 + $0x18] sm:$0xff]  ;;  %v265_v15 = vld [vmem:[%s1192_s30 + $0x10] sm:$0xff]  ;;  %v264_v16 = vld [vmem:[%s1192_s30 + $0x8] sm:$0xff] }
  0x65   : > { %663 = vmatprep.subr.mxu0 %v1032_v2  ;;  %726 = vmatprep.mubr.msk.f32.mxu1 %vm1033_vm0, %v1032_v2  ;;  %v263_v17 = vld [vmem:[%s1192_s30] sm:$0xff]  ;;  %v281_v18 = vld [vmem:[%s280_s26] sm:$0xff] }
  0x66   : > { %697 = vmatpush3.xpose.msra.mxu1 %v277_v3  ;;  %664 = vmatpush3.msra.mxu0 %v276_v4  ;;  %v284_v19 = vld [vmem:[%s283_s13] sm:$0xff] }
  0x67   : > { %698 = vmatprep.subr.mxu1 %v1032_v2  ;;  %665 = vmatprep.subr.mxu0 %v1032_v2  ;;  %v426_v20 = vld [vmem:[%s425_s27] sm:$0xff] }
  0x68   : > { %666 = vmatpush3.msra.mxu0 %v275_v5 }
  0x69   : > { %667 = vmatprep.subr.mxu0 %v1032_v2 }
  0x6a   : > { %699 = vmatpush3.xpose.msra.mxu1 %v276_v4  ;;  %668 = vmatpush3.msra.mxu0 %v274_v6 }
  0x6b   : > { %700 = vmatprep.subr.mxu1 %v1032_v2  ;;  %669 = vmatprep.subr.mxu0 %v1032_v2 }
  0x6c   : > { %670 = vmatpush3.msra.mxu0 %v273_v7 }
  0x6d   : > { %671 = vmatprep.subr.mxu0 %v1032_v2 }
  0x6e   : > { %701 = vmatpush3.xpose.msra.mxu1 %v275_v5  ;;  %672 = vmatpush3.msra.mxu0 %v272_v8 }
  0x6f   : > { %702 = vmatprep.subr.mxu1 %v1032_v2  ;;  %673 = vmatprep.subr.mxu0 %v1032_v2 }
  0x70   : > { %674 = vmatpush3.msra.mxu0 %v271_v9 }
  0x71   : > { %675 = vmatprep.subr.mxu0 %v1032_v2 }
  0x72   : > { %703 = vmatpush3.xpose.msra.mxu1 %v274_v6  ;;  %676 = vmatpush3.msra.mxu0 %v270_v10 }
  0x73   : > { %704 = vmatprep.subr.mxu1 %v1032_v2  ;;  %677 = vmatprep.subr.mxu0 %v1032_v2 }
  0x74   : > { %678 = vmatpush3.msra.mxu0 %v269_v11 }
  0x75   : > { %679 = vmatprep.subr.mxu0 %v1032_v2 }
  0x76   : > { %705 = vmatpush3.xpose.msra.mxu1 %v273_v7  ;;  %680 = vmatpush3.msra.mxu0 %v268_v12 }
  0x77   : > { %706 = vmatprep.subr.mxu1 %v1032_v2  ;;  %681 = vmatprep.subr.mxu0 %v1032_v2 }
  0x78   : > { %682 = vmatpush3.msra.mxu0 %v267_v13 }
  0x79   : > { %683 = vmatprep.subr.mxu0 %v1032_v2 }
  0x7a   : > { %707 = vmatpush3.xpose.msra.mxu1 %v272_v8  ;;  %684 = vmatpush3.msra.mxu0 %v266_v14 }
  0x7b   : > { %708 = vmatprep.subr.mxu1 %v1032_v2  ;;  %685 = vmatprep.subr.mxu0 %v1032_v2 }
  0x7c   : > { %686 = vmatpush3.msra.mxu0 %v265_v15 }
  0x7d   : > { %687 = vmatprep.subr.mxu0 %v1032_v2 }
  0x7e   : > { %709 = vmatpush3.xpose.msra.mxu1 %v271_v9  ;;  %688 = vmatpush3.msra.mxu0 %v264_v16 }
  0x7f   : > { %710 = vmatprep.subr.mxu1 %v1032_v2  ;;  %689 = vmatprep.subr.mxu0 %v1032_v2 }
  0x80   : > { %690 = vmatpush3.msra.mxu0 %v263_v17 }
  0x81   : > { %692 = vmatmul.mubr.f32.vlgmr.msra.gmra.mxu0 %v281_v18 }
  0x82   : > { %711 = vmatpush3.xpose.msra.mxu1 %v270_v10 }
  0x83   : > { %712 = vmatprep.subr.mxu1 %v1032_v2 }
  0x86   : > { %713 = vmatpush3.xpose.msra.mxu1 %v269_v11 }
  0x87   : > { %714 = vmatprep.subr.mxu1 %v1032_v2 }
  0x8a   : > { %715 = vmatpush3.xpose.msra.mxu1 %v268_v12 }
  0x8b   : > { %716 = vmatprep.subr.mxu1 %v1032_v2 }
  0x8e   : > { %717 = vmatpush3.xpose.msra.mxu1 %v267_v13 }
  0x8f   : > { %718 = vmatprep.subr.mxu1 %v1032_v2 }
  0x92   : > { %719 = vmatpush3.xpose.msra.mxu1 %v266_v14 }
  0x93   : > { %720 = vmatprep.subr.mxu1 %v1032_v2 }
  0x96   : > { %721 = vmatpush3.xpose.msra.mxu1 %v265_v15 }
  0x97   : > { %722 = vmatprep.subr.mxu1 %v1032_v2 }
  0x9a   : > { %723 = vmatpush3.xpose.msra.mxu1 %v264_v16 }
  0x9b   : > { %724 = vmatprep.subr.mxu1 %v1032_v2 }
  0x9e   : > { %725 = vmatpush3.xpose.msra.mxu1 %v263_v17 }
  0xa1   : > { %727 = vmatmul.mubr.f32.vlgmr.msra.gmra.mxu1 %v284_v19 }
 0x141   : > { %v351_v21 = vpop.f32.mrf.mxu0 }
 0x142   : > { %v427_v22 = vadd.f32 %v426_v20, %v351_v21 }
 0x143   : > { %v693_v23 = vpop.f32.mrf.mxu0 }
 0x144   : > { %428 = vst [vmem:[%s425_s27] sm:$0xff] %v427_v22 }
 0x14b   : > { %v430_v24 = vld [vmem:[%s429_s28] sm:$0xff] }
 0x160   : > { %434 = sbr.rel (%p1206_p1) target bundleno = 372 (0x174), region = 56 }
 0x161   : > { %v421_v25 = vpop.f32.mrf.mxu1 }
 0x162   : > { %v431_v26 = vadd.f32 %v430_v24, %v421_v25 }
 0x163   : > { %v728_v27 = vpop.f32.mrf.mxu1 }
 0x164   : > { %432 = vst [vmem:[%s429_s28] sm:$0xff] %v431_v26 }
 0x165   : > { %v615_v29 = vld [vmem:[#allocation7] ss:$0 sm:$0xff]  ;;  %v465_v30 = vld [vmem:[#allocation2] sm:$0xff]  ;;  %v616_v34 = vld [vmem:[#allocation7 + $0x1] ss:$0 sm:$0xff] }
 0x166   : > { %v618_v32 = vld [vmem:[%s1315_s2] ss:$0 sm:$0xff]  ;;  %v466_v37 = vld [vmem:[#allocation2 + $0x8] sm:$0xff]  ;;  %v619_v38 = vld [vmem:[%s1315_s2 + $0x1] ss:$0 sm:$0xff] }
 0x167   : > { %v489_v35 = vmul.f32 %v618_v32, %v465_v30  ;;  %v490_v41 = vmul.f32 %v619_v38, %v466_v37  ;;  %v617_v43 = vld [vmem:[#allocation7 + $0x2] ss:$0 sm:$0xff]  ;;  %v467_v44 = vld [vmem:[#allocation2 + $0x10] sm:$0xff]  ;;  %v620_v45 = vld [vmem:[%s1315_s2 + $0x2] ss:$0 sm:$0xff] }
 0x168   : > { %v491_v47 = vmul.f32 %v620_v45, %v467_v44 }
 0x16b   : > { %v435_v28 = vld [vmem:[#allocation8] sm:$0xff]  ;;  %v436_v33 = vld [vmem:[#allocation8 + $0x8] sm:$0xff]  ;;  %v437_v39 = vld [vmem:[#allocation8 + $0x10] sm:$0xff] }
 0x16c   : > { %v438_v31 = vmul.f32 0.5, %v435_v28  ;;  %v439_v36 = vmul.f32 0.5, %v436_v33  ;;  %v440_v42 = vmul.f32 0.5, %v437_v39 }
 0x16e   : > { %v462_v40 = vadd.f32 %v615_v29, %v438_v31  ;;  %v463_v46 = vadd.f32 %v616_v34, %v439_v36  ;;  %v464_v49 = vadd.f32 %v617_v43, %v440_v42 }
 0x170   : > { %v492_v48 = vsub.f32 %v462_v40, %v489_v35  ;;  %v493_v50 = vsub.f32 %v463_v46, %v490_v41  ;;  %v494_v51 = vsub.f32 %v464_v49, %v491_v47 }
 0x172   : > { %495 = vst [vmem:[#allocation8] sm:$0xff] %v492_v48  ;;  %496 = vst [vmem:[#allocation8 + $0x8] sm:$0xff] %v493_v50 }
 0x173   : > { %497 = vst [vmem:[#allocation8 + $0x10] sm:$0xff] %v494_v51 }
 0x174 PF: > { %p760_p6 = scmp.eq.s32.totalorder %s1101_s23, 8  ;;  %s1034_s24 = smov [#allocation8]  }
 0x175   : > { %s504_s3 = sshll.u32 %s1034_s24, 4  ;;  %s505_s3 = int_to_ptr.vmem [resolvable:$true] %s504_s3 }
 0x176   : > { %s919_s14 = scalar_lea.vmem %s505_s3, 384  ;;  %p926_p13 = scmp.lt.s32.totalorder %s505_s3, %s505_s3 }
 0x177   : > { %p920_p3 = scmp.ne.s32.totalorder %s505_s3, %s919_s14  ;;  %p927_p7 = scmp.lt.s32.totalorder %s919_s14, %s919_s14 }
 0x179   : > { %p921_p2 = pnand %p920_p3, %p760_p6  ;;  %p928_p8 = por %p927_p7, %p926_p13 }
 0x17b   : > { %p922_p5 = pneg %p921_p2 }
 0x17d   : > { %p929_p12 = pnand %p928_p8, %p922_p5 }
 0x17f   : > { %932 = shalt.err (!%p929_p12)
}
 0x180   : > { %s1035_s22 = smov 128   ;;  %s1036_s15 = smov 8  }
 0x181   : > { %741 = dma.vmem_to_hbm [thread:$0]  (%p760_p6), %s505_s3, 384, %s1317_s4, [#allocation4], %s1035_s22, %s1035_s22, %s1036_s15  }
 0x182   : > { %988 = dma.done.wait (%p760_p6), [#allocation4], 384  }
 0x183   : > { %990 = vsyncadd (%p760_p6), [#allocation4], 4294966912 }
 0x184 PF: > { %s1341_s30 = sld [smem:[#allocation13_spill]]  ;;  %s1343_s15 = smov %s997_s16 }
 0x185   : > { %s1342_s0 = sld [smem:[#allocation14_spill]]  ;;  %s1344_s16 = smov %s1001_s17 }
 0x186   : > { %s1345_s17 = smov %s1176_s5  ;;  %s1346_s18 = smov %s1013_s20 }
 0x187   : > { %s1347_s19 = smov %s1017_s21  ;;  %s1349_s21 = smov %s1355_s6 }
 0x18a   : > { %s19_s22 = sadd.s32 1, %s1341_s30  }
 0x18b   : > { %p16_p11 = scmp.ge.s32.totalorder %s19_s22, 11   ;;  %s1348_s20 = smov %s1342_s0 }
 0x18d   :  { %18 = sbr.rel (!%p16_p11) target bundleno = 10 (0xa), region = 94 }
 0x192   :  { %520 = vsyncpa [#allocation3], 1 }
 0x193   :  { %522 = vsyncpa [#allocation3 + $0x1], 1 }
 0x194   :  { %523 = vsyncpa [#allocation6], 1 }
 0x195   :  { %525 = vsyncpa [#allocation6 + $0x1], 1 }
 0x196   :  { %526 = vsyncpa [#allocation4], 1 }
 0x197   :  { %528 = vsyncpa [#allocation4 + $0x1], 1 }

</bundles_post_ra>
